<compile_context>
chip_gen: v6e
topology: v6e:2x2x1
jax: 0.10.0
libtpu: 0.0.40
codegen_flags: <defaults>
</compile_context>

<pallas_src>
import jax
import jax.numpy as jnp
from jax import lax
from jax.experimental import pallas as pl
from jax.experimental.pallas import tpu as pltpu

D_IN, D_H, D_OUT = 784, 256, 10


def mlp_kernel(x_ref, w1_ref, b1_ref, w2_ref, b2_ref, o_ref):
    x = x_ref[...]

    # hidden = sigmoid(x @ W1^T + b1); W1 stays in PyTorch (256, 784) layout,
    # contraction is x dim 1 vs. W1 dim 1 (MXU handles the transposed RHS).
    h = lax.dot_general(
        x, w1_ref[...],
        dimension_numbers=(((1,), (1,)), ((), ())),
        preferred_element_type=jnp.float32,
    )
    h = h + b1_ref[...]
    h = pl.reciprocal(1.0 + jnp.exp(-h), approx=False)  # sigmoid (EUP exp + recip)

    # logits = h @ W2^T + b2; W2 is (10, 256).
    logits = lax.dot_general(
        h, w2_ref[...],
        dimension_numbers=(((1,), (1,)), ((), ())),
        preferred_element_type=jnp.float32,
    )
    logits = logits + b2_ref[...]

    # softmax over dim=1 (feature axis), max-stabilized.
    m = jnp.max(logits, axis=1, keepdims=True)
    e = jnp.exp(logits - m)
    denom = jnp.sum(e, axis=1, keepdims=True)
    o_ref[...] = (e * pl.reciprocal(denom, approx=False)).astype(o_ref.dtype)


def _round_up(n, m):
    return ((n + m - 1) // m) * m


def network_2_forward(x, w1, b1, w2, b2, *, tb=512):
    """x: (B, 784); w1: (256, 784); b1: (256,); w2: (10, 256); b2: (10,)."""
    B = x.shape[0]

    # Batch tile: multiple of 8 (sublanes); cap at `tb` (~512 keeps the MXU fed
    # while x double-buffer + resident weights stay at a few MiB of VMEM).
    TB = min(tb, _round_up(B, 8))
    Bp = _round_up(B, TB)
    if Bp != B:
        x = jnp.pad(x, ((0, Bp - B), (0, 0)))

    b1_r = b1.reshape(1, D_H)
    b2_r = b2.reshape(1, D_OUT)

    grid = (Bp // TB,)

    out = pl.pallas_call(
        mlp_kernel,
        out_shape=jax.ShapeDtypeStruct((Bp, D_OUT), jnp.float32),
        grid_spec=pltpu.PrefetchScalarGridSpec(
            num_scalar_prefetch=0,
            grid=grid,
            in_specs=[
                # x: tiled over batch.
                pl.BlockSpec((TB, D_IN), lambda i: (i, 0)),
                # Weights / biases: full blocks, constant index -> VMEM-resident.
                pl.BlockSpec((D_H, D_IN), lambda i: (0, 0)),
                pl.BlockSpec((1, D_H), lambda i: (0, 0)),
                pl.BlockSpec((D_OUT, D_H), lambda i: (0, 0)),
                pl.BlockSpec((1, D_OUT), lambda i: (0, 0)),
            ],
            out_specs=pl.BlockSpec((TB, D_OUT), lambda i: (i, 0)),
        ),
        compiler_params=pltpu.CompilerParams(
            dimension_semantics=("parallel",),           # megacore on v7x
            vmem_limit_bytes=32 * 1024 * 1024,
        ),
    )(x, w1, b1_r, w2, b2_r)

    return out[:B] if Bp != B else out


def reference_forward(x, w1, b1, w2, b2):
    h = jax.nn.sigmoid(x @ w1.T + b1)
    return jax.nn.softmax(h @ w2.T + b2, axis=1)


if __name__ == "__main__":
    key = jax.random.PRNGKey(0)
    k_x, k_w1, k_b1, k_w2, k_b2 = jax.random.split(key, 5)

    # Deterministic parameter init (PyTorch Linear-style uniform bounds).
    bound1 = 1.0 / (784.0 ** 0.5)
    w1 = jax.random.uniform(k_w1, (256, 784), jnp.float32, -bound1, bound1)
    b1 = jax.random.uniform(k_b1, (256,), jnp.float32, -bound1, bound1)
    bound2 = 1.0 / (256.0 ** 0.5)
    w2 = jax.random.uniform(k_w2, (10, 256), jnp.float32, -bound2, bound2)
    b2 = jax.random.uniform(k_b2, (10,), jnp.float32, -bound2, bound2)

    # Test 1: small batch (single grid step).
    B = 8
    x = jax.random.normal(k_x, (B, D_IN), dtype=jnp.float32)
    out = jax.block_until_ready(network_2_forward(x, w1, b1, w2, b2))
    ref = reference_forward(x, w1, b1, w2, b2)
    assert out.shape == (B, D_OUT)
    assert jnp.allclose(out, ref, atol=1e-5, rtol=1e-5), "mismatch vs reference (B=8)"
    assert jnp.allclose(jnp.sum(out, axis=1), 1.0, atol=1e-5), "rows must sum to 1"

    # Test 2: exercise the tiled / padded path (B=40, TB=16 -> grid of 3, padding).
    B2 = 40
    x2 = jax.random.normal(jax.random.PRNGKey(1), (B2, D_IN), dtype=jnp.float32)
    out2 = jax.block_until_ready(network_2_forward(x2, w1, b1, w2, b2, tb=16))
    ref2 = reference_forward(x2, w1, b1, w2, b2)
    assert out2.shape == (B2, D_OUT)
    assert jnp.allclose(out2, ref2, atol=1e-5, rtol=1e-5), "mismatch vs reference (tiled)"
    assert jnp.allclose(jnp.sum(out2, axis=1), 1.0, atol=1e-5), "rows must sum to 1 (tiled)"

    print("KERNEL_OK")
</pallas_src>

<mosaic_0001>
module attributes {stable_mosaic.version = 11 : i64} {
  func.func @mlp_kernel(%arg0: i32, %arg1: memref<8x784xf32, #tpu.memory_space<vmem>>, %arg2: memref<256x784xf32, #tpu.memory_space<vmem>>, %arg3: memref<1x256xf32, #tpu.memory_space<vmem>>, %arg4: memref<10x256xf32, #tpu.memory_space<vmem>>, %arg5: memref<1x10xf32, #tpu.memory_space<vmem>>, %arg6: memref<8x10xf32, #tpu.memory_space<vmem>>) attributes {dimension_semantics = [#tpu.dimension_semantics<parallel>], iteration_bounds = array<i64: 1>, scalar_prefetch = 0 : i64, scratch_operands = 0 : i64, tpu.core_type = #tpu.core_type<tc>, window_params = [{transform_indices = @transform_0, window_bounds = array<i64: 8, 784>}, {pipeline_mode = #tpu.pipeline_mode<synchronous>, transform_indices = @transform_1, window_bounds = array<i64: 256, 784>}, {pipeline_mode = #tpu.pipeline_mode<synchronous>, transform_indices = @transform_2, window_bounds = array<i64: 1, 256>}, {pipeline_mode = #tpu.pipeline_mode<synchronous>, transform_indices = @transform_3, window_bounds = array<i64: 10, 256>}, {pipeline_mode = #tpu.pipeline_mode<synchronous>, transform_indices = @transform_4, window_bounds = array<i64: 1, 10>}, {transform_indices = @transform_5, window_bounds = array<i64: 8, 10>}]} {
    %c0 = arith.constant 0 : index
    %c0_0 = arith.constant 0 : index
    %0 = vector.load %arg1[%c0, %c0_0] : memref<8x784xf32, #tpu.memory_space<vmem>>, vector<8x784xf32>
    %c0_1 = arith.constant 0 : index
    %c0_2 = arith.constant 0 : index
    %1 = vector.load %arg2[%c0_1, %c0_2] : memref<256x784xf32, #tpu.memory_space<vmem>>, vector<256x784xf32>
    %cst = arith.constant dense<0.000000e+00> : vector<8x256xf32>
    %2 = tpu.matmul %0, %1, %cst {dimension_numbers = #tpu.dot_dimension_numbers<[1], [1], [0], [0], [0, 0, 1, 0], [], []>} : vector<8x784xf32>, vector<256x784xf32>, vector<8x256xf32> -> vector<8x256xf32>
    %c0_3 = arith.constant 0 : index
    %c0_4 = arith.constant 0 : index
    %3 = vector.load %arg3[%c0_3, %c0_4] : memref<1x256xf32, #tpu.memory_space<vmem>>, vector<1x256xf32>
    %4 = vector.broadcast %3 : vector<1x256xf32> to vector<8x256xf32>
    %5 = arith.addf %2, %4 : vector<8x256xf32>
    %cst_5 = arith.constant 0.000000e+00 : f32
    %6 = vector.broadcast %cst_5 : f32 to vector<8x256xf32>
    %7 = arith.subf %6, %5 : vector<8x256xf32>
    %8 = math.exp %7 : vector<8x256xf32>
    %cst_6 = arith.constant 1.000000e+00 : f32
    %9 = vector.broadcast %cst_6 : f32 to vector<8x256xf32>
    %10 = arith.addf %9, %8 : vector<8x256xf32>
    %11 = tpu.reciprocal %10 : vector<8x256xf32> -> vector<8x256xf32>
    %c0_7 = arith.constant 0 : index
    %c0_8 = arith.constant 0 : index
    %12 = vector.load %arg4[%c0_7, %c0_8] : memref<10x256xf32, #tpu.memory_space<vmem>>, vector<10x256xf32>
    %cst_9 = arith.constant dense<0.000000e+00> : vector<8x10xf32>
    %13 = tpu.matmul %11, %12, %cst_9 {dimension_numbers = #tpu.dot_dimension_numbers<[1], [1], [0], [0], [0, 0, 1, 0], [], []>} : vector<8x256xf32>, vector<10x256xf32>, vector<8x10xf32> -> vector<8x10xf32>
    %c0_10 = arith.constant 0 : index
    %c0_11 = arith.constant 0 : index
    %14 = vector.load %arg5[%c0_10, %c0_11] : memref<1x10xf32, #tpu.memory_space<vmem>>, vector<1x10xf32>
    %15 = vector.broadcast %14 : vector<1x10xf32> to vector<8x10xf32>
    %16 = arith.addf %13, %15 : vector<8x10xf32>
    %cst_12 = arith.constant dense<0xFF800000> : vector<8xf32>
    %17 = vector.multi_reduction <maximumf>, %16, %cst_12 [1] : vector<8x10xf32> to vector<8xf32>
    %18 = vector.shape_cast %17 : vector<8xf32> to vector<8x1xf32>
    %19 = vector.broadcast %18 : vector<8x1xf32> to vector<8x10xf32>
    %20 = arith.subf %16, %19 : vector<8x10xf32>
    %21 = math.exp %20 : vector<8x10xf32>
    %cst_13 = arith.constant dense<0.000000e+00> : vector<8xf32>
    %22 = vector.multi_reduction <add>, %21, %cst_13 [1] : vector<8x10xf32> to vector<8xf32>
    %23 = vector.shape_cast %22 : vector<8xf32> to vector<8x1xf32>
    %24 = tpu.reciprocal %23 : vector<8x1xf32> -> vector<8x1xf32>
    %25 = vector.broadcast %24 : vector<8x1xf32> to vector<8x10xf32>
    %26 = arith.mulf %21, %25 : vector<8x10xf32>
    %c0_14 = arith.constant 0 : index
    %c0_15 = arith.constant 0 : index
    %27 = vector.load %arg6[%c0_14, %c0_15] : memref<8x10xf32, #tpu.memory_space<vmem>>, vector<8x10xf32>
    tpu.vector_store %arg6[%c0_14, %c0_15], %26 {strides = array<i32>} : memref<8x10xf32, #tpu.memory_space<vmem>>, vector<8x10xf32>,
    return
  }
  func.func @transform_0(%arg0: i32) -> (i32, i32) {
    %c0_i32 = arith.constant 0 : i32
    %c0_i32_0 = arith.constant 0 : i32
    return %arg0, %c0_i32 : i32, i32
  }
  func.func @transform_1(%arg0: i32) -> (i32, i32) {
    %c0_i32 = arith.constant 0 : i32
    %c0_i32_0 = arith.constant 0 : i32
    %c0_i32_1 = arith.constant 0 : i32
    return %c0_i32, %c0_i32_0 : i32, i32
  }
  func.func @transform_2(%arg0: i32) -> (i32, i32) {
    %c0_i32 = arith.constant 0 : i32
    %c0_i32_0 = arith.constant 0 : i32
    %c0_i32_1 = arith.constant 0 : i32
    return %c0_i32, %c0_i32_0 : i32, i32
  }
  func.func @transform_3(%arg0: i32) -> (i32, i32) {
    %c0_i32 = arith.constant 0 : i32
    %c0_i32_0 = arith.constant 0 : i32
    %c0_i32_1 = arith.constant 0 : i32
    return %c0_i32, %c0_i32_0 : i32, i32
  }
  func.func @transform_4(%arg0: i32) -> (i32, i32) {
    %c0_i32 = arith.constant 0 : i32
    %c0_i32_0 = arith.constant 0 : i32
    %c0_i32_1 = arith.constant 0 : i32
    return %c0_i32, %c0_i32_0 : i32, i32
  }
  func.func @transform_5(%arg0: i32) -> (i32, i32) {
    %c0_i32 = arith.constant 0 : i32
    %c0_i32_0 = arith.constant 0 : i32
    return %arg0, %c0_i32 : i32, i32
  }
}

</mosaic_0001>

<bundles_post_ra>
// kernel: tpu_custom_call.1
= control target key start
LH: loop header
LB: loop body
LE: loop exit
PB: predicated region body
PF: predicated region fallthrough
CT: control target
= control target key end

     0   :  { %s1655_s0 = inlined_call_operand.vmem [shape: f32[8,784], index: 0, kind: input, shape index: {}]   ;;  %s1656_s1 = inlined_call_operand.vmem [shape: f32[256,784], index: 1, kind: input, shape index: {}]   ;;  %s1657_s2 = inlined_call_operand.vmem [shape: f32[1,256], index: 2, kind: input, shape index: {}]   ;;  %s1658_s3 = inlined_call_operand.vmem [shape: f32[10,256], index: 3, kind: input, shape index: {}]   ;;  %s1659_s4 = inlined_call_operand.vmem [shape: f32[1,10], index: 4, kind: input, shape index: {}]   ;;  %s1660_s5 = inlined_call_operand.hbm [shape: f32[8,10], index: 5, kind: output, shape index: {}]  }
   0x1   :  { %v134_v0 = vld [vmem:[%s1656_s1 + $0x350] sm:$0xff]  ;;  %v133_v1 = vld [vmem:[%s1656_s1 + $0x348] sm:$0xff]  ;;  %v136_v2 = vld [vmem:[%s1656_s1 + $0x360] sm:$0xff] }
   0x2   :  { %364 = vmatprep.subr.mxu0 %v134_v0  ;;  %435 = vmatprep.subr.mxu1 %v136_v2  ;;  %v135_v3 = vld [vmem:[%s1656_s1 + $0x358] sm:$0xff]  ;;  %v129_v5 = vld [vmem:[%s1656_s1 + $0x328] sm:$0xff]  ;;  %v126_v6 = vld [vmem:[%s1656_s1 + $0x310] sm:$0xff] }
   0x3   :  { %v127_v4 = vld [vmem:[%s1656_s1 + $0x318] sm:$0xff]  ;;  %365 = vmatpush1.xpose.msra.mxu0 %v133_v1  ;;  %436 = vmatpush1.xpose.msra.mxu1 %v135_v3  ;;  %v128_v7 = vld [vmem:[%s1656_s1 + $0x320] sm:$0xff]  ;;  %v122_v9 = vld [vmem:[%s1656_s1 + $0x2f0] sm:$0xff] }
   0x4   :  { %366 = vmatprep.subr.mxu0 %v127_v4  ;;  %437 = vmatprep.subr.mxu1 %v129_v5  ;;  %v120_v8 = vld [vmem:[%s1656_s1 + $0x2e0] sm:$0xff]  ;;  %v119_v10 = vld [vmem:[%s1656_s1 + $0x2d8] sm:$0xff]  ;;  %v121_v11 = vld [vmem:[%s1656_s1 + $0x2e8] sm:$0xff] }
   0x5   :  { %v113_v12 = vld [vmem:[%s1656_s1 + $0x2a8] sm:$0xff]  ;;  %v115_v13 = vld [vmem:[%s1656_s1 + $0x2b8] sm:$0xff]  ;;  %v112_v14 = vld [vmem:[%s1656_s1 + $0x2a0] sm:$0xff] }
   0x6   :  { %v114_v15 = vld [vmem:[%s1656_s1 + $0x2b0] sm:$0xff]  ;;  %v108_v17 = vld [vmem:[%s1656_s1 + $0x280] sm:$0xff]  ;;  %v105_v18 = vld [vmem:[%s1656_s1 + $0x268] sm:$0xff] }
   0x7   :  { %367 = vmatpush1.xpose.msra.mxu0 %v126_v6  ;;  %438 = vmatpush1.xpose.msra.mxu1 %v128_v7  ;;  %v106_v16 = vld [vmem:[%s1656_s1 + $0x270] sm:$0xff]  ;;  %v107_v19 = vld [vmem:[%s1656_s1 + $0x278] sm:$0xff]  ;;  %v101_v21 = vld [vmem:[%s1656_s1 + $0x248] sm:$0xff] }
   0x8   :  { %368 = vmatprep.subr.mxu0 %v120_v8  ;;  %439 = vmatprep.subr.mxu1 %v122_v9  ;;  %v99_v20 = vld [vmem:[%s1656_s1 + $0x238] sm:$0xff]  ;;  %v98_v22 = vld [vmem:[%s1656_s1 + $0x230] sm:$0xff]  ;;  %v100_v23 = vld [vmem:[%s1656_s1 + $0x240] sm:$0xff] }
   0x9   :  { %v92_v24 = vld [vmem:[%s1656_s1 + $0x200] sm:$0xff]  ;;  %v94_v25 = vld [vmem:[%s1656_s1 + $0x210] sm:$0xff]  ;;  %v91_v26 = vld [vmem:[%s1656_s1 + $0x1f8] sm:$0xff] }
   0xa   :  { %v93_v27 = vld [vmem:[%s1656_s1 + $0x208] sm:$0xff]  ;;  %v87_v29 = vld [vmem:[%s1656_s1 + $0x1d8] sm:$0xff]  ;;  %v84_v30 = vld [vmem:[%s1656_s1 + $0x1c0] sm:$0xff] }
   0xb   :  { %369 = vmatpush1.xpose.msra.mxu0 %v119_v10  ;;  %440 = vmatpush1.xpose.msra.mxu1 %v121_v11  ;;  %v85_v28 = vld [vmem:[%s1656_s1 + $0x1c8] sm:$0xff]  ;;  %v86_v31 = vld [vmem:[%s1656_s1 + $0x1d0] sm:$0xff]  ;;  %v80_v33 = vld [vmem:[%s1656_s1 + $0x1a0] sm:$0xff] }
   0xc   :  { %370 = vmatprep.subr.mxu0 %v113_v12  ;;  %441 = vmatprep.subr.mxu1 %v115_v13  ;;  %v78_v32 = vld [vmem:[%s1656_s1 + $0x190] sm:$0xff]  ;;  %v77_v34 = vld [vmem:[%s1656_s1 + $0x188] sm:$0xff]  ;;  %v79_v35 = vld [vmem:[%s1656_s1 + $0x198] sm:$0xff] }
   0xd   :  { %v71_v36 = vld [vmem:[%s1656_s1 + $0x158] sm:$0xff]  ;;  %v73_v37 = vld [vmem:[%s1656_s1 + $0x168] sm:$0xff]  ;;  %v70_v38 = vld [vmem:[%s1656_s1 + $0x150] sm:$0xff] }
   0xe   :  { %v72_v39 = vld [vmem:[%s1656_s1 + $0x160] sm:$0xff]  ;;  %v66_v41 = vld [vmem:[%s1656_s1 + $0x130] sm:$0xff]  ;;  %v63_v42 = vld [vmem:[%s1656_s1 + $0x118] sm:$0xff] }
   0xf   :  { %371 = vmatpush1.xpose.msra.mxu0 %v112_v14  ;;  %442 = vmatpush1.xpose.msra.mxu1 %v114_v15  ;;  %v64_v40 = vld [vmem:[%s1656_s1 + $0x120] sm:$0xff]  ;;  %v65_v43 = vld [vmem:[%s1656_s1 + $0x128] sm:$0xff]  ;;  %v59_v45 = vld [vmem:[%s1656_s1 + $0xf8] sm:$0xff] }
  0x10   :  { %372 = vmatprep.subr.mxu0 %v106_v16  ;;  %443 = vmatprep.subr.mxu1 %v108_v17  ;;  %v57_v44 = vld [vmem:[%s1656_s1 + $0xe8] sm:$0xff]  ;;  %v56_v47 = vld [vmem:[%s1656_s1 + $0xe0] sm:$0xff]  ;;  %v58_v48 = vld [vmem:[%s1656_s1 + $0xf0] sm:$0xff] }
  0x11   :  { %v22_v46 = vld [vmem:[%s1655_s0 + $0x8] sm:$0xff]  ;;  %v24_v49 = vld [vmem:[%s1655_s0 + $0x18] sm:$0xff]  ;;  %v50_v50 = vld [vmem:[%s1656_s1 + $0xb0] sm:$0xff] }
  0x12   :  { %v52_v51 = vld [vmem:[%s1656_s1 + $0xc0] sm:$0xff]  ;;  %428 = vmatprep.mubr.f32.mxu0 %v22_v46  ;;  %499 = vmatprep.mubr.f32.mxu1 %v24_v49  ;;  %v49_v52 = vld [vmem:[%s1656_s1 + $0xa8] sm:$0xff]  ;;  %v51_v53 = vld [vmem:[%s1656_s1 + $0xb8] sm:$0xff] }
  0x13   :  { %373 = vmatpush1.xpose.msra.mxu0 %v105_v18  ;;  %444 = vmatpush1.xpose.msra.mxu1 %v107_v19  ;;  %v43_v54 = vld [vmem:[%s1656_s1 + $0x78] sm:$0xff]  ;;  %v45_v55 = vld [vmem:[%s1656_s1 + $0x88] sm:$0xff]  ;;  %v42_v56 = vld [vmem:[%s1656_s1 + $0x70] sm:$0xff] }
  0x14   :  { %374 = vmatprep.subr.mxu0 %v99_v20  ;;  %445 = vmatprep.subr.mxu1 %v101_v21  ;;  %v44_v57 = vld [vmem:[%s1656_s1 + $0x80] sm:$0xff]  ;;  %v38_v59 = vld [vmem:[%s1656_s1 + $0x50] sm:$0xff] }
  0x15   :  { %v36_v58 = vld [vmem:[%s1656_s1 + $0x40] sm:$0xff] }
  0x17   :  { %375 = vmatpush1.xpose.msra.mxu0 %v98_v22  ;;  %446 = vmatpush1.xpose.msra.mxu1 %v100_v23 }
  0x18   :  { %376 = vmatprep.subr.mxu0 %v92_v24  ;;  %447 = vmatprep.subr.mxu1 %v94_v25 }
  0x1b   :  { %377 = vmatpush1.xpose.msra.mxu0 %v91_v26  ;;  %448 = vmatpush1.xpose.msra.mxu1 %v93_v27 }
  0x1c   :  { %378 = vmatprep.subr.mxu0 %v85_v28  ;;  %449 = vmatprep.subr.mxu1 %v87_v29 }
  0x1f   :  { %379 = vmatpush1.xpose.msra.mxu0 %v84_v30  ;;  %450 = vmatpush1.xpose.msra.mxu1 %v86_v31 }
  0x20   :  { %380 = vmatprep.subr.mxu0 %v78_v32  ;;  %451 = vmatprep.subr.mxu1 %v80_v33 }
  0x23   :  { %381 = vmatpush1.xpose.msra.mxu0 %v77_v34  ;;  %452 = vmatpush1.xpose.msra.mxu1 %v79_v35 }
  0x24   :  { %382 = vmatprep.subr.mxu0 %v71_v36  ;;  %453 = vmatprep.subr.mxu1 %v73_v37 }
  0x27   :  { %383 = vmatpush1.xpose.msra.mxu0 %v70_v38  ;;  %454 = vmatpush1.xpose.msra.mxu1 %v72_v39 }
  0x28   :  { %384 = vmatprep.subr.mxu0 %v64_v40  ;;  %455 = vmatprep.subr.mxu1 %v66_v41 }
  0x2b   :  { %385 = vmatpush1.xpose.msra.mxu0 %v63_v42  ;;  %456 = vmatpush1.xpose.msra.mxu1 %v65_v43 }
  0x2c   :  { %386 = vmatprep.subr.mxu0 %v57_v44  ;;  %457 = vmatprep.subr.mxu1 %v59_v45 }
  0x2f   :  { %387 = vmatpush1.xpose.msra.mxu0 %v56_v47  ;;  %458 = vmatpush1.xpose.msra.mxu1 %v58_v48 }
  0x30   :  { %388 = vmatprep.subr.mxu0 %v50_v50  ;;  %459 = vmatprep.subr.mxu1 %v52_v51 }
  0x33   :  { %389 = vmatpush1.xpose.msra.mxu0 %v49_v52  ;;  %460 = vmatpush1.xpose.msra.mxu1 %v51_v53 }
  0x34   :  { %390 = vmatprep.subr.mxu0 %v43_v54  ;;  %461 = vmatprep.subr.mxu1 %v45_v55 }
  0x35   :  { %10 = vsyncpa [#allocation3], 0  ;;  %v35_v60 = vld [vmem:[%s1656_s1 + $0x38] sm:$0xff]  ;;  %v37_v61 = vld [vmem:[%s1656_s1 + $0x48] sm:$0xff]  ;;  %vm264_vm0 = vcmask 130048   ;;  %vm739_vm1 = vcmask 80896  }
  0x36   :  { %v29_v62 = vld [vmem:[%s1656_s1 + $0x8] sm:$0xff]  ;;  %v31_v63 = vld [vmem:[%s1656_s1 + $0x18] sm:$0xff]  ;;  %v28_v0 = vld [vmem:[%s1656_s1] sm:$0xff]  ;;  %s869_s13 = smov [#allocation2]  }
  0x37   :  { %391 = vmatpush1.xpose.msra.mxu0 %v42_v56  ;;  %462 = vmatpush1.xpose.msra.mxu1 %v44_v57  ;;  %v30_v1 = vld [vmem:[%s1656_s1 + $0x10] sm:$0xff]  ;;  %v248_v3 = vld [vmem:[%s1656_s1 + $0x6e0] sm:$0xff]  ;;  %v245_v4 = vld [vmem:[%s1656_s1 + $0x6c8] sm:$0xff]  ;;  %s758_s14 = sshll.u32 %s869_s13, 4  ;;  %s759_s14 = int_to_ptr.vmem [resolvable:$true] %s758_s14 }
  0x38   :  { %392 = vmatprep.subr.mxu0 %v36_v58  ;;  %463 = vmatprep.subr.mxu1 %v38_v59  ;;  %v246_v2 = vld [vmem:[%s1656_s1 + $0x6d0] sm:$0xff]  ;;  %v247_v5 = vld [vmem:[%s1656_s1 + $0x6d8] sm:$0xff]  ;;  %v241_v7 = vld [vmem:[%s1656_s1 + $0x6a8] sm:$0xff]  ;;  %p852_p1 = scmp.lt.s32.totalorder %s759_s14, %s759_s14 }
  0x39   :  { %v239_v6 = vld [vmem:[%s1656_s1 + $0x698] sm:$0xff]  ;;  %v238_v8 = vld [vmem:[%s1656_s1 + $0x690] sm:$0xff]  ;;  %v240_v9 = vld [vmem:[%s1656_s1 + $0x6a0] sm:$0xff] }
  0x3a   :  { %v232_v10 = vld [vmem:[%s1656_s1 + $0x660] sm:$0xff]  ;;  %v234_v11 = vld [vmem:[%s1656_s1 + $0x670] sm:$0xff]  ;;  %v231_v12 = vld [vmem:[%s1656_s1 + $0x658] sm:$0xff] }
  0x3b   :  { %393 = vmatpush1.xpose.msra.mxu0 %v35_v60  ;;  %464 = vmatpush1.xpose.msra.mxu1 %v37_v61  ;;  %v233_v13 = vld [vmem:[%s1656_s1 + $0x668] sm:$0xff]  ;;  %v227_v15 = vld [vmem:[%s1656_s1 + $0x638] sm:$0xff]  ;;  %v224_v16 = vld [vmem:[%s1656_s1 + $0x620] sm:$0xff] }
  0x3c   :  { %394 = vmatprep.subr.mxu0 %v29_v62  ;;  %465 = vmatprep.subr.mxu1 %v31_v63  ;;  %v225_v14 = vld [vmem:[%s1656_s1 + $0x628] sm:$0xff]  ;;  %v226_v17 = vld [vmem:[%s1656_s1 + $0x630] sm:$0xff]  ;;  %v220_v19 = vld [vmem:[%s1656_s1 + $0x600] sm:$0xff] }
  0x3d   :  { %v218_v18 = vld [vmem:[%s1656_s1 + $0x5f0] sm:$0xff]  ;;  %v217_v20 = vld [vmem:[%s1656_s1 + $0x5e8] sm:$0xff]  ;;  %v219_v21 = vld [vmem:[%s1656_s1 + $0x5f8] sm:$0xff] }
  0x3e   :  { %v211_v22 = vld [vmem:[%s1656_s1 + $0x5b8] sm:$0xff]  ;;  %v213_v23 = vld [vmem:[%s1656_s1 + $0x5c8] sm:$0xff]  ;;  %v210_v24 = vld [vmem:[%s1656_s1 + $0x5b0] sm:$0xff] }
  0x3f   :  { %395 = vmatpush1.xpose.msra.mxu0 %v28_v0  ;;  %466 = vmatpush1.xpose.msra.mxu1 %v30_v1  ;;  %v212_v25 = vld [vmem:[%s1656_s1 + $0x5c0] sm:$0xff]  ;;  %v206_v27 = vld [vmem:[%s1656_s1 + $0x590] sm:$0xff]  ;;  %v203_v28 = vld [vmem:[%s1656_s1 + $0x578] sm:$0xff] }
  0x40   :  { %396 = vmatprep.subr.mxu0 %v246_v2  ;;  %467 = vmatprep.subr.mxu1 %v248_v3  ;;  %v204_v26 = vld [vmem:[%s1656_s1 + $0x580] sm:$0xff]  ;;  %v205_v29 = vld [vmem:[%s1656_s1 + $0x588] sm:$0xff]  ;;  %v199_v31 = vld [vmem:[%s1656_s1 + $0x558] sm:$0xff] }
  0x41   :  { %v197_v30 = vld [vmem:[%s1656_s1 + $0x548] sm:$0xff]  ;;  %v196_v32 = vld [vmem:[%s1656_s1 + $0x540] sm:$0xff]  ;;  %v198_v33 = vld [vmem:[%s1656_s1 + $0x550] sm:$0xff] }
  0x42   :  { %v190_v34 = vld [vmem:[%s1656_s1 + $0x510] sm:$0xff]  ;;  %v192_v35 = vld [vmem:[%s1656_s1 + $0x520] sm:$0xff]  ;;  %v189_v36 = vld [vmem:[%s1656_s1 + $0x508] sm:$0xff] }
  0x43   :  { %397 = vmatpush2.xpose.msra.mxu0 %v245_v4  ;;  %468 = vmatpush2.xpose.msra.mxu1 %v247_v5  ;;  %v191_v37 = vld [vmem:[%s1656_s1 + $0x518] sm:$0xff]  ;;  %v185_v39 = vld [vmem:[%s1656_s1 + $0x4e8] sm:$0xff]  ;;  %v182_v40 = vld [vmem:[%s1656_s1 + $0x4d0] sm:$0xff] }
  0x44   :  { %398 = vmatprep.subr.mxu0 %v239_v6  ;;  %469 = vmatprep.subr.mxu1 %v241_v7  ;;  %v183_v38 = vld [vmem:[%s1656_s1 + $0x4d8] sm:$0xff]  ;;  %v184_v41 = vld [vmem:[%s1656_s1 + $0x4e0] sm:$0xff]  ;;  %v178_v43 = vld [vmem:[%s1656_s1 + $0x4b0] sm:$0xff] }
  0x45   :  { %v176_v42 = vld [vmem:[%s1656_s1 + $0x4a0] sm:$0xff]  ;;  %v175_v44 = vld [vmem:[%s1656_s1 + $0x498] sm:$0xff]  ;;  %v177_v45 = vld [vmem:[%s1656_s1 + $0x4a8] sm:$0xff] }
  0x46   :  { %v169_v46 = vld [vmem:[%s1656_s1 + $0x468] sm:$0xff]  ;;  %v171_v47 = vld [vmem:[%s1656_s1 + $0x478] sm:$0xff]  ;;  %v168_v48 = vld [vmem:[%s1656_s1 + $0x460] sm:$0xff] }
  0x47   :  { %399 = vmatpush2.xpose.msra.mxu0 %v238_v8  ;;  %470 = vmatpush2.xpose.msra.mxu1 %v240_v9  ;;  %v170_v49 = vld [vmem:[%s1656_s1 + $0x470] sm:$0xff]  ;;  %v164_v51 = vld [vmem:[%s1656_s1 + $0x440] sm:$0xff]  ;;  %v161_v52 = vld [vmem:[%s1656_s1 + $0x428] sm:$0xff] }
  0x48   :  { %400 = vmatprep.subr.mxu0 %v232_v10  ;;  %471 = vmatprep.subr.mxu1 %v234_v11  ;;  %v162_v50 = vld [vmem:[%s1656_s1 + $0x430] sm:$0xff]  ;;  %v163_v53 = vld [vmem:[%s1656_s1 + $0x438] sm:$0xff]  ;;  %v157_v55 = vld [vmem:[%s1656_s1 + $0x408] sm:$0xff] }
  0x49   :  { %v155_v54 = vld [vmem:[%s1656_s1 + $0x3f8] sm:$0xff]  ;;  %v154_v56 = vld [vmem:[%s1656_s1 + $0x3f0] sm:$0xff]  ;;  %v156_v57 = vld [vmem:[%s1656_s1 + $0x400] sm:$0xff] }
  0x4a   :  { %v148_v58 = vld [vmem:[%s1656_s1 + $0x3c0] sm:$0xff]  ;;  %v150_v59 = vld [vmem:[%s1656_s1 + $0x3d0] sm:$0xff]  ;;  %v147_v60 = vld [vmem:[%s1656_s1 + $0x3b8] sm:$0xff] }
  0x4b   :  { %401 = vmatpush2.xpose.msra.mxu0 %v231_v12  ;;  %472 = vmatpush2.xpose.msra.mxu1 %v233_v13  ;;  %v149_v61 = vld [vmem:[%s1656_s1 + $0x3c8] sm:$0xff]  ;;  %v143_v63 = vld [vmem:[%s1656_s1 + $0x398] sm:$0xff]  ;;  %v140_v0 = vld [vmem:[%s1656_s1 + $0x380] sm:$0xff] }
  0x4c   :  { %402 = vmatprep.subr.mxu0 %v225_v14  ;;  %473 = vmatprep.subr.mxu1 %v227_v15  ;;  %v141_v62 = vld [vmem:[%s1656_s1 + $0x388] sm:$0xff]  ;;  %v142_v1 = vld [vmem:[%s1656_s1 + $0x390] sm:$0xff]  ;;  %v251_v3 = vld [vmem:[%s1656_s1 + $0x6f8] sm:$0xff] }
  0x4d   :  { %v138_v2 = vld [vmem:[%s1656_s1 + $0x370] sm:$0xff]  ;;  %v21_v4 = vld [vmem:[%s1655_s0] sm:$0xff]  ;;  %v137_v6 = vld [vmem:[%s1656_s1 + $0x368] sm:$0xff] }
  0x4e   :  { %v23_v5 = vld [vmem:[%s1655_s0 + $0x10] sm:$0xff]  ;;  %v139_v7 = vld [vmem:[%s1656_s1 + $0x378] sm:$0xff]  ;;  %v244_v9 = vld [vmem:[%s1656_s1 + $0x6c0] sm:$0xff] }
  0x4f   :  { %403 = vmatpush2.xpose.msra.mxu0 %v224_v16  ;;  %474 = vmatpush2.xpose.msra.mxu1 %v226_v17  ;;  %v131_v8 = vld [vmem:[%s1656_s1 + $0x338] sm:$0xff]  ;;  %v26_v10 = vld [vmem:[%s1655_s0 + $0x28] sm:$0xff]  ;;  %v1321_v11 = vld [vmem:[%s1655_s0 + $0x30] sm:$0xff] }
  0x50   :  { %404 = vmatprep.subr.mxu0 %v218_v18  ;;  %475 = vmatprep.subr.mxu1 %v220_v19  ;;  %v130_v12 = vld [vmem:[%s1656_s1 + $0x330] sm:$0xff]  ;;  %v132_v13 = vld [vmem:[%s1656_s1 + $0x340] sm:$0xff]  ;;  %v237_v15 = vld [vmem:[%s1656_s1 + $0x688] sm:$0xff] }
  0x51   :  { %v124_v14 = vld [vmem:[%s1656_s1 + $0x300] sm:$0xff]  ;;  %v123_v16 = vld [vmem:[%s1656_s1 + $0x2f8] sm:$0xff]  ;;  %v125_v17 = vld [vmem:[%s1656_s1 + $0x308] sm:$0xff] }
  0x52   :  { %v117_v18 = vld [vmem:[%s1656_s1 + $0x2c8] sm:$0xff]  ;;  %v230_v19 = vld [vmem:[%s1656_s1 + $0x650] sm:$0xff] }
  0x53   :  { %405 = vmatpush2.xpose.msra.mxu0 %v217_v20  ;;  %476 = vmatpush2.xpose.msra.mxu1 %v219_v21  ;;  %v116_v20 = vld [vmem:[%s1656_s1 + $0x2c0] sm:$0xff]  ;;  %v118_v21 = vld [vmem:[%s1656_s1 + $0x2d0] sm:$0xff] }
  0x54   :  { %406 = vmatprep.subr.mxu0 %v211_v22  ;;  %477 = vmatprep.subr.mxu1 %v213_v23  ;;  %v110_v22 = vld [vmem:[%s1656_s1 + $0x290] sm:$0xff]  ;;  %v223_v23 = vld [vmem:[%s1656_s1 + $0x618] sm:$0xff] }
  0x57   :  { %407 = vmatpush2.xpose.msra.mxu0 %v210_v24  ;;  %478 = vmatpush2.xpose.msra.mxu1 %v212_v25  ;;  %v109_v24 = vld [vmem:[%s1656_s1 + $0x288] sm:$0xff]  ;;  %v111_v25 = vld [vmem:[%s1656_s1 + $0x298] sm:$0xff] }
  0x58   :  { %408 = vmatprep.subr.mxu0 %v204_v26  ;;  %479 = vmatprep.subr.mxu1 %v206_v27  ;;  %v103_v26 = vld [vmem:[%s1656_s1 + $0x258] sm:$0xff]  ;;  %v216_v27 = vld [vmem:[%s1656_s1 + $0x5e0] sm:$0xff] }
  0x5b   :  { %409 = vmatpush2.xpose.msra.mxu0 %v203_v28  ;;  %480 = vmatpush2.xpose.msra.mxu1 %v205_v29  ;;  %v102_v28 = vld [vmem:[%s1656_s1 + $0x250] sm:$0xff]  ;;  %v104_v29 = vld [vmem:[%s1656_s1 + $0x260] sm:$0xff] }
  0x5c   :  { %410 = vmatprep.subr.mxu0 %v197_v30  ;;  %481 = vmatprep.subr.mxu1 %v199_v31  ;;  %v96_v30 = vld [vmem:[%s1656_s1 + $0x220] sm:$0xff]  ;;  %v209_v31 = vld [vmem:[%s1656_s1 + $0x5a8] sm:$0xff] }
  0x5f   :  { %411 = vmatpush2.xpose.msra.mxu0 %v196_v32  ;;  %482 = vmatpush2.xpose.msra.mxu1 %v198_v33  ;;  %v95_v32 = vld [vmem:[%s1656_s1 + $0x218] sm:$0xff]  ;;  %v97_v33 = vld [vmem:[%s1656_s1 + $0x228] sm:$0xff] }
  0x60   :  { %412 = vmatprep.subr.mxu0 %v190_v34  ;;  %483 = vmatprep.subr.mxu1 %v192_v35  ;;  %v89_v34 = vld [vmem:[%s1656_s1 + $0x1e8] sm:$0xff]  ;;  %v202_v35 = vld [vmem:[%s1656_s1 + $0x570] sm:$0xff] }
  0x63   :  { %413 = vmatpush2.xpose.msra.mxu0 %v189_v36  ;;  %484 = vmatpush2.xpose.msra.mxu1 %v191_v37  ;;  %v88_v36 = vld [vmem:[%s1656_s1 + $0x1e0] sm:$0xff]  ;;  %v90_v37 = vld [vmem:[%s1656_s1 + $0x1f0] sm:$0xff] }
  0x64   :  { %414 = vmatprep.subr.mxu0 %v183_v38  ;;  %485 = vmatprep.subr.mxu1 %v185_v39  ;;  %v82_v38 = vld [vmem:[%s1656_s1 + $0x1b0] sm:$0xff]  ;;  %v195_v39 = vld [vmem:[%s1656_s1 + $0x538] sm:$0xff] }
  0x67   :  { %415 = vmatpush2.xpose.msra.mxu0 %v182_v40  ;;  %486 = vmatpush2.xpose.msra.mxu1 %v184_v41  ;;  %v81_v40 = vld [vmem:[%s1656_s1 + $0x1a8] sm:$0xff]  ;;  %v83_v41 = vld [vmem:[%s1656_s1 + $0x1b8] sm:$0xff] }
  0x68   :  { %416 = vmatprep.subr.mxu0 %v176_v42  ;;  %487 = vmatprep.subr.mxu1 %v178_v43  ;;  %v75_v42 = vld [vmem:[%s1656_s1 + $0x178] sm:$0xff]  ;;  %v188_v43 = vld [vmem:[%s1656_s1 + $0x500] sm:$0xff] }
  0x6b   :  { %417 = vmatpush2.xpose.msra.mxu0 %v175_v44  ;;  %488 = vmatpush2.xpose.msra.mxu1 %v177_v45  ;;  %v74_v44 = vld [vmem:[%s1656_s1 + $0x170] sm:$0xff]  ;;  %v76_v45 = vld [vmem:[%s1656_s1 + $0x180] sm:$0xff] }
  0x6c   :  { %418 = vmatprep.subr.mxu0 %v169_v46  ;;  %489 = vmatprep.subr.mxu1 %v171_v47  ;;  %v68_v46 = vld [vmem:[%s1656_s1 + $0x140] sm:$0xff]  ;;  %v181_v47 = vld [vmem:[%s1656_s1 + $0x4c8] sm:$0xff] }
  0x6f   :  { %419 = vmatpush2.xpose.msra.mxu0 %v168_v48  ;;  %490 = vmatpush2.xpose.msra.mxu1 %v170_v49  ;;  %v67_v48 = vld [vmem:[%s1656_s1 + $0x138] sm:$0xff]  ;;  %v69_v49 = vld [vmem:[%s1656_s1 + $0x148] sm:$0xff] }
  0x70   :  { %420 = vmatprep.subr.mxu0 %v162_v50  ;;  %491 = vmatprep.subr.mxu1 %v164_v51  ;;  %v61_v50 = vld [vmem:[%s1656_s1 + $0x108] sm:$0xff]  ;;  %v174_v51 = vld [vmem:[%s1656_s1 + $0x490] sm:$0xff] }
  0x73   :  { %421 = vmatpush2.xpose.msra.mxu0 %v161_v52  ;;  %492 = vmatpush2.xpose.msra.mxu1 %v163_v53  ;;  %v60_v52 = vld [vmem:[%s1656_s1 + $0x100] sm:$0xff]  ;;  %v62_v53 = vld [vmem:[%s1656_s1 + $0x110] sm:$0xff] }
  0x74   :  { %422 = vmatprep.subr.mxu0 %v155_v54  ;;  %493 = vmatprep.subr.mxu1 %v157_v55  ;;  %v54_v54 = vld [vmem:[%s1656_s1 + $0xd0] sm:$0xff]  ;;  %v167_v55 = vld [vmem:[%s1656_s1 + $0x458] sm:$0xff] }
  0x77   :  { %423 = vmatpush2.xpose.msra.mxu0 %v154_v56  ;;  %494 = vmatpush2.xpose.msra.mxu1 %v156_v57  ;;  %v53_v56 = vld [vmem:[%s1656_s1 + $0xc8] sm:$0xff]  ;;  %v55_v57 = vld [vmem:[%s1656_s1 + $0xd8] sm:$0xff] }
  0x78   :  { %424 = vmatprep.subr.mxu0 %v148_v58  ;;  %495 = vmatprep.subr.mxu1 %v150_v59  ;;  %v47_v58 = vld [vmem:[%s1656_s1 + $0x98] sm:$0xff]  ;;  %v160_v59 = vld [vmem:[%s1656_s1 + $0x420] sm:$0xff] }
  0x7b   :  { %425 = vmatpush2.xpose.msra.mxu0 %v147_v60  ;;  %496 = vmatpush2.xpose.msra.mxu1 %v149_v61  ;;  %v46_v60 = vld [vmem:[%s1656_s1 + $0x90] sm:$0xff]  ;;  %v48_v61 = vld [vmem:[%s1656_s1 + $0xa0] sm:$0xff] }
  0x7c   :  { %426 = vmatprep.subr.mxu0 %v141_v62  ;;  %497 = vmatprep.subr.mxu1 %v143_v63  ;;  %v40_v62 = vld [vmem:[%s1656_s1 + $0x60] sm:$0xff]  ;;  %v153_v63 = vld [vmem:[%s1656_s1 + $0x3e8] sm:$0xff] }
  0x7f   :  { %427 = vmatpush2.xpose.msra.mxu0 %v140_v0  ;;  %498 = vmatpush2.xpose.msra.mxu1 %v142_v1  ;;  %v39_v0 = vld [vmem:[%s1656_s1 + $0x58] sm:$0xff]  ;;  %v41_v1 = vld [vmem:[%s1656_s1 + $0x68] sm:$0xff] }
  0x80   :  { %506 = vmatprep.subr.mxu0 %v138_v2  ;;  %800 = vmatprep.subr.msk.mxu1 %vm264_vm0, %v251_v3  ;;  %v33_v2 = vld [vmem:[%s1656_s1 + $0x28] sm:$0xff]  ;;  %v146_v3 = vld [vmem:[%s1656_s1 + $0x3b0] sm:$0xff] }
  0x82   :  { %429 = vmatmul.mubr.f32.vlgmr.msra.gmra.mxu0 %v21_v4  ;;  %500 = vmatmul.mubr.f32.vlgmr.msra.gmra.mxu1 %v23_v5  ;;  %v32_v4 = vld [vmem:[%s1656_s1 + $0x20] sm:$0xff]  ;;  %v34_v5 = vld [vmem:[%s1656_s1 + $0x30] sm:$0xff] }
  0x83   :  { %507 = vmatpush1.xpose.msra.mxu0 %v137_v6  ;;  %801 = vmatpush3.xpose.msk.msra.mxu1 %vm264_vm0, %v139_v7  ;;  %v250_v6 = vld [vmem:[%s1656_s1 + $0x6f0] sm:$0xff]  ;;  %v249_v7 = vld [vmem:[%s1656_s1 + $0x6e8] sm:$0xff] }
  0x84   :  { %508 = vmatprep.subr.mxu0 %v131_v8  ;;  %802 = vmatprep.subr.msk.mxu1 %vm264_vm0, %v244_v9  ;;  %v243_v8 = vld [vmem:[%s1656_s1 + $0x6b8] sm:$0xff]  ;;  %v242_v9 = vld [vmem:[%s1656_s1 + $0x6b0] sm:$0xff] }
  0x85   :  { %570 = vmatprep.mubr.f32.mxu0 %v26_v10  ;;  %832 = vmatprep.mubr.msk.f32.mxu1 %vm264_vm0, %v1321_v11  ;;  %v236_v10 = vld [vmem:[%s1656_s1 + $0x680] sm:$0xff] }
  0x87   :  { %509 = vmatpush1.xpose.msra.mxu0 %v130_v12  ;;  %803 = vmatpush3.xpose.msk.msra.mxu1 %vm264_vm0, %v132_v13  ;;  %v235_v12 = vld [vmem:[%s1656_s1 + $0x678] sm:$0xff]  ;;  %v228_v13 = vld [vmem:[%s1656_s1 + $0x640] sm:$0xff] }
  0x88   :  { %510 = vmatprep.subr.mxu0 %v124_v14  ;;  %804 = vmatprep.subr.msk.mxu1 %vm264_vm0, %v237_v15  ;;  %v222_v14 = vld [vmem:[%s1656_s1 + $0x610] sm:$0xff]  ;;  %v221_v15 = vld [vmem:[%s1656_s1 + $0x608] sm:$0xff] }
  0x8b   :  { %511 = vmatpush1.xpose.msra.mxu0 %v123_v16  ;;  %805 = vmatpush3.xpose.msk.msra.mxu1 %vm264_vm0, %v125_v17  ;;  %v215_v16 = vld [vmem:[%s1656_s1 + $0x5d8] sm:$0xff]  ;;  %v214_v17 = vld [vmem:[%s1656_s1 + $0x5d0] sm:$0xff] }
  0x8c   :  { %512 = vmatprep.subr.mxu0 %v117_v18  ;;  %806 = vmatprep.subr.msk.mxu1 %vm264_vm0, %v230_v19  ;;  %v208_v18 = vld [vmem:[%s1656_s1 + $0x5a0] sm:$0xff]  ;;  %v207_v19 = vld [vmem:[%s1656_s1 + $0x598] sm:$0xff] }
  0x8f   :  { %513 = vmatpush1.xpose.msra.mxu0 %v116_v20  ;;  %807 = vmatpush3.xpose.msk.msra.mxu1 %vm264_vm0, %v118_v21  ;;  %v201_v20 = vld [vmem:[%s1656_s1 + $0x568] sm:$0xff]  ;;  %v200_v21 = vld [vmem:[%s1656_s1 + $0x560] sm:$0xff] }
  0x90   :  { %514 = vmatprep.subr.mxu0 %v110_v22  ;;  %808 = vmatprep.subr.msk.mxu1 %vm264_vm0, %v223_v23  ;;  %v194_v22 = vld [vmem:[%s1656_s1 + $0x530] sm:$0xff]  ;;  %v193_v23 = vld [vmem:[%s1656_s1 + $0x528] sm:$0xff] }
  0x93   :  { %515 = vmatpush1.xpose.msra.mxu0 %v109_v24  ;;  %809 = vmatpush3.xpose.msk.msra.mxu1 %vm264_vm0, %v111_v25  ;;  %v187_v24 = vld [vmem:[%s1656_s1 + $0x4f8] sm:$0xff]  ;;  %v186_v25 = vld [vmem:[%s1656_s1 + $0x4f0] sm:$0xff] }
  0x94   :  { %516 = vmatprep.subr.mxu0 %v103_v26  ;;  %810 = vmatprep.subr.msk.mxu1 %vm264_vm0, %v216_v27  ;;  %v180_v26 = vld [vmem:[%s1656_s1 + $0x4c0] sm:$0xff]  ;;  %v179_v27 = vld [vmem:[%s1656_s1 + $0x4b8] sm:$0xff] }
  0x97   :  { %517 = vmatpush1.xpose.msra.mxu0 %v102_v28  ;;  %811 = vmatpush3.xpose.msk.msra.mxu1 %vm264_vm0, %v104_v29  ;;  %v173_v28 = vld [vmem:[%s1656_s1 + $0x488] sm:$0xff]  ;;  %v172_v29 = vld [vmem:[%s1656_s1 + $0x480] sm:$0xff] }
  0x98   :  { %518 = vmatprep.subr.mxu0 %v96_v30  ;;  %812 = vmatprep.subr.msk.mxu1 %vm264_vm0, %v209_v31  ;;  %v166_v30 = vld [vmem:[%s1656_s1 + $0x450] sm:$0xff]  ;;  %v165_v31 = vld [vmem:[%s1656_s1 + $0x448] sm:$0xff] }
  0x9b   :  { %519 = vmatpush1.xpose.msra.mxu0 %v95_v32  ;;  %813 = vmatpush3.xpose.msk.msra.mxu1 %vm264_vm0, %v97_v33  ;;  %v159_v32 = vld [vmem:[%s1656_s1 + $0x418] sm:$0xff]  ;;  %v158_v33 = vld [vmem:[%s1656_s1 + $0x410] sm:$0xff] }
  0x9c   :  { %520 = vmatprep.subr.mxu0 %v89_v34  ;;  %814 = vmatprep.subr.msk.mxu1 %vm264_vm0, %v202_v35  ;;  %v152_v34 = vld [vmem:[%s1656_s1 + $0x3e0] sm:$0xff]  ;;  %v151_v35 = vld [vmem:[%s1656_s1 + $0x3d8] sm:$0xff] }
  0x9f   :  { %521 = vmatpush1.xpose.msra.mxu0 %v88_v36  ;;  %815 = vmatpush3.xpose.msk.msra.mxu1 %vm264_vm0, %v90_v37  ;;  %v145_v36 = vld [vmem:[%s1656_s1 + $0x3a8] sm:$0xff]  ;;  %v144_v37 = vld [vmem:[%s1656_s1 + $0x3a0] sm:$0xff] }
  0xa0   :  { %522 = vmatprep.subr.mxu0 %v82_v38  ;;  %816 = vmatprep.subr.msk.mxu1 %vm264_vm0, %v195_v39  ;;  %v25_v38 = vld [vmem:[%s1655_s0 + $0x20] sm:$0xff]  ;;  %v661_v39 = vld [vmem:[%s1658_s3 + $0x18] sm:$0x3] }
  0xa3   :  { %523 = vmatpush1.xpose.msra.mxu0 %v81_v40  ;;  %817 = vmatpush3.xpose.msk.msra.mxu1 %vm264_vm0, %v83_v41  ;;  %v660_v40 = vld [vmem:[%s1658_s3 + $0x10] sm:$0x3]  ;;  %v659_v41 = vld [vmem:[%s1658_s3 + $0x8] sm:$0xff] }
  0xa4   :  { %524 = vmatprep.subr.mxu0 %v75_v42  ;;  %818 = vmatprep.subr.msk.mxu1 %vm264_vm0, %v188_v43  ;;  %v658_v42 = vld [vmem:[%s1658_s3] sm:$0xff]  ;;  %v254_v43 = vlaneseq }
  0xa7   :  { %525 = vmatpush1.xpose.msra.mxu0 %v74_v44  ;;  %819 = vmatpush3.xpose.msk.msra.mxu1 %vm264_vm0, %v76_v45  ;;  %v255_v44 = vshrl.u32 %v254_v43, 7 }
  0xa8   :  { %526 = vmatprep.subr.mxu0 %v68_v46  ;;  %820 = vmatprep.subr.msk.mxu1 %vm264_vm0, %v181_v47  ;;  %v252_v46 = vld [vmem:[%s1657_s2] sm:$0x3] }
  0xa9   :  { %v256_v45 = vsub.s32 0, %v255_v44  ;;  %v260_v47 = vsub.s32 1, %v255_v44 }
  0xab   :  { %527 = vmatpush1.xpose.msra.mxu0 %v67_v48  ;;  %821 = vmatpush3.xpose.msk.msra.mxu1 %vm264_vm0, %v69_v49  ;;  %v257_v49 = vrot.slane %v252_v46, %v256_v45 }
  0xac   :  { %528 = vmatprep.subr.mxu0 %v61_v50  ;;  %822 = vmatprep.subr.msk.mxu1 %vm264_vm0, %v174_v51  ;;  %v261_v50 = vrot.slane %v252_v46, %v260_v47 }
  0xaf   :  { %529 = vmatpush1.xpose.msra.mxu0 %v60_v52  ;;  %823 = vmatpush3.xpose.msk.msra.mxu1 %vm264_vm0, %v62_v53 }
  0xb0   :  { %530 = vmatprep.subr.mxu0 %v54_v54  ;;  %824 = vmatprep.subr.msk.mxu1 %vm264_vm0, %v167_v55 }
  0xb3   :  { %531 = vmatpush1.xpose.msra.mxu0 %v53_v56  ;;  %825 = vmatpush3.xpose.msk.msra.mxu1 %vm264_vm0, %v55_v57 }
  0xb4   :  { %532 = vmatprep.subr.mxu0 %v47_v58  ;;  %826 = vmatprep.subr.msk.mxu1 %vm264_vm0, %v160_v59 }
  0xb7   :  { %533 = vmatpush1.xpose.msra.mxu0 %v46_v60  ;;  %827 = vmatpush3.xpose.msk.msra.mxu1 %vm264_vm0, %v48_v61 }
  0xb8   :  { %534 = vmatprep.subr.mxu0 %v40_v62  ;;  %828 = vmatprep.subr.msk.mxu1 %vm264_vm0, %v153_v63 }
  0xbb   :  { %535 = vmatpush1.xpose.msra.mxu0 %v39_v0  ;;  %829 = vmatpush3.xpose.msk.msra.mxu1 %vm264_vm0, %v41_v1 }
  0xbc   :  { %536 = vmatprep.subr.mxu0 %v33_v2  ;;  %830 = vmatprep.subr.msk.mxu1 %vm264_vm0, %v146_v3 }
  0xbf   :  { %537 = vmatpush1.xpose.msra.mxu0 %v32_v4  ;;  %831 = vmatpush3.xpose.msk.msra.mxu1 %vm264_vm0, %v34_v5 }
  0xc0   :  { %538 = vmatprep.subr.mxu0 %v250_v6  ;;  %697 = vmatprep.subr.mxu1 %v661_v39 }
  0xc2   :  { %833 = vmatmul.mubr.msk.f32.vlgmr.msra.gmra.mxu1 %vm264_vm0, %v1321_v11  ;;  %v229_v11 = vld [vmem:[%s1656_s1 + $0x648] sm:$0xff] }
  0xc3   :  { %539 = vmatpush2.xpose.msra.mxu0 %v249_v7  ;;  %698 = vmatpush1.xpose.msra.mxu1 %v660_v40 }
  0xc4   :  { %540 = vmatprep.subr.mxu0 %v243_v8  ;;  %699 = vmatprep.subr.mxu1 %v659_v41 }
  0xc7   :  { %541 = vmatpush2.xpose.msra.mxu0 %v242_v9  ;;  %700 = vmatpush1.xpose.msra.mxu1 %v658_v42 }
  0xc8   :  { %542 = vmatprep.subr.mxu0 %v236_v10 }
  0xcb   :  { %543 = vmatpush2.xpose.msra.mxu0 %v235_v12 }
  0xcc   :  { %544 = vmatprep.subr.mxu0 %v229_v11  ;;  %v799_v11 = vld [vmem:[%s1659_s4] ss:$0 sm:$0xff]  ;;  %s847_s4 = scalar_lea.vmem %s759_s14, 128 }
  0xcd   :  { %p848_p0 = scmp.ne.s32.totalorder %s759_s14, %s847_s4  ;;  %p853_p2 = scmp.lt.s32.totalorder %s847_s4, %s847_s4 }
  0xcf   :  { %545 = vmatpush2.xpose.msra.mxu0 %v228_v13  ;;  %p854_p3 = por %p853_p2, %p852_p1 }
  0xd0   :  { %546 = vmatprep.subr.mxu0 %v222_v14 }
  0xd1   :  { %p855_p4 = pnand %p854_p3, %p848_p0 }
  0xd3   :  { %547 = vmatpush2.xpose.msra.mxu0 %v221_v15 }
  0xd4   :  { %548 = vmatprep.subr.mxu0 %v215_v16 }
  0xd7   :  { %549 = vmatpush2.xpose.msra.mxu0 %v214_v17 }
  0xd8   :  { %550 = vmatprep.subr.mxu0 %v208_v18 }
  0xdb   :  { %551 = vmatpush2.xpose.msra.mxu0 %v207_v19 }
  0xdc   :  { %552 = vmatprep.subr.mxu0 %v201_v20 }
  0xdf   :  { %553 = vmatpush2.xpose.msra.mxu0 %v200_v21 }
  0xe0   :  { %554 = vmatprep.subr.mxu0 %v194_v22 }
  0xe3   :  { %555 = vmatpush2.xpose.msra.mxu0 %v193_v23 }
  0xe4   :  { %556 = vmatprep.subr.mxu0 %v187_v24 }
  0xe7   :  { %557 = vmatpush2.xpose.msra.mxu0 %v186_v25 }
  0xe8   :  { %558 = vmatprep.subr.mxu0 %v180_v26 }
  0xeb   :  { %559 = vmatpush2.xpose.msra.mxu0 %v179_v27 }
  0xec   :  { %560 = vmatprep.subr.mxu0 %v173_v28 }
  0xef   :  { %561 = vmatpush2.xpose.msra.mxu0 %v172_v29 }
  0xf0   :  { %562 = vmatprep.subr.mxu0 %v166_v30 }
  0xf3   :  { %563 = vmatpush2.xpose.msra.mxu0 %v165_v31 }
  0xf4   :  { %564 = vmatprep.subr.mxu0 %v159_v32 }
  0xf7   :  { %565 = vmatpush2.xpose.msra.mxu0 %v158_v33 }
  0xf8   :  { %566 = vmatprep.subr.mxu0 %v152_v34 }
  0xfb   :  { %567 = vmatpush2.xpose.msra.mxu0 %v151_v35 }
  0xfc   :  { %568 = vmatprep.subr.mxu0 %v145_v36 }
  0xff   :  { %569 = vmatpush2.xpose.msra.mxu0 %v144_v37 }
 0x102   :  { %571 = vmatmul.mubr.f32.vlgmr.msra.gmra.mxu0 %v25_v38 }
 0x142   :  { %v430_v48 = vpop.f32.mrf.mxu0  ;;  %v501_v52 = vpop.f32.mrf.mxu1 }
 0x143   :  { %v431_v53 = vadd.f32 %v430_v48, %v257_v49 }
 0x144   :  { %v432_v51 = vpop.f32.mrf.mxu0  ;;  %v503_v55 = vpop.f32.mrf.mxu1 }
 0x145   :  { %v433_v54 = vadd.f32 %v432_v51, %v261_v50  ;;  %v502_v56 = vadd.f32 %v501_v52, %v431_v53 }
 0x147   :  { %v504_v59 = vadd.f32 %v503_v55, %v433_v54 }
 0x182   :  { %v643_v58 = vpop.f32.mrf.mxu1 }
 0x184   :  { %v645_v0 = vpop.f32.mrf.mxu1 }
 0x1c2   :  { %v572_v57 = vpop.f32.mrf.mxu0 }
 0x1c3   :  { %v573_v60 = vadd.f32 %v572_v57, %v502_v56 }
 0x1c4   :  { %v574_v61 = vpop.f32.mrf.mxu0 }
 0x1c5   :  { %v644_v62 = vadd.f32 %v643_v58, %v573_v60  ;;  %v575_v63 = vadd.f32 %v574_v61, %v504_v59 }
 0x1c7   :  { %v648_v1 = vsub.f32 0.0, %v644_v62  ;;  %v646_v2 = vadd.f32 %v645_v0, %v575_v63 }
 0x1c9   :  { %v650_v3 = vmul.f32 1.442695, %v648_v1  ;;  %v649_v4 = vsub.f32 0.0, %v646_v2 }
 0x1cb   :  { %835 = vpow2.f32 %v650_v3  ;;  %v652_v5 = vmul.f32 1.442695, %v649_v4 }
 0x1cd   :  { %837 = vpow2.f32 %v652_v5 }
 0x1d8   :  { %v836_v6 = vpop.eup %835 }
 0x1d9   :  { %v654_v8 = vadd.f32 1.0, %v836_v6 }
 0x1da   :  { %v838_v7 = vpop.eup %837 }
 0x1db   :  { %v655_v9 = vadd.f32 1.0, %v838_v7 }
 0x1dd   :  { %839 = vrcp.f32 %v655_v9 }
 0x1de   :  { %841 = vrcp.f32 %v654_v8 }
 0x1ea   :  { %v840_v10 = vpop.eup %839 }
 0x1eb   :  { %v842_v12 = vpop.eup %841  ;;  %733 = vmatprep.mubr.f32.mxu1 %v840_v10 }
 0x1ec   :  { %734 = vmatmul.mubr.f32.vlgmr.msra.gmra.mxu1 %v842_v12 }
 0x2ac   :  { %v735_v13 = vpop.f32.mrf.mxu1 }
 0x2ad   :  { %v736_v14 = vadd.f32 %v799_v11, %v735_v13 }
 0x2ae   :  { %v737_v15 = vpop.f32.mrf.mxu1 }
 0x2af   :  { %v740_v16 = vsel %vm739_vm1, %v736_v14, -inf }
 0x2b0   :  { %741 = vmax.xlane.f32.xlu0 %v740_v16 }
 0x339   :  { %v742_v17 = vpop.xlane.xlu0 %741 }
 0x33a   :  { %v743_v18 = vsub.f32 %v736_v14, %v742_v17 }
 0x33c   :  { %v744_v19 = vmul.f32 1.442695, %v743_v18 }
 0x33e   :  { %843 = vpow2.f32 %v744_v19 }
 0x34b   :  { %v844_v20 = vpop.eup %843 }
 0x34c   :  { %v746_v21 = vsel %vm739_vm1, %v844_v20, 0.0 }
 0x34d   :  { %747 = vadd.xlane.f32.xlu0 %v746_v21 }
 0x3d6   :  { %v748_v22 = vpop.xlane.xlu0 %747 }
 0x3d7   :  { %845 = vrcp.f32 %v748_v22 }
 0x3e4   :  { %v846_v23 = vpop.eup %845 }
 0x3e5   :  { %v750_v24 = vmul.f32 %v846_v23, %v844_v20 }
 0x3e7   :  { %751 = vst.msk [vmem:[#allocation2] sm:$0xff] %vm739_vm1, %v750_v24 }
 0x3e8   :  { %858 = shalt.err (!%p855_p4)
}
 0x3e9   :  { %761 = dma.vmem_to_hbm [thread:$0]  %s759_s14, 128, %s1660_s5, [#allocation3]  }
 0x3ea   :  { %867 = dma.done.wait [#allocation3], 128  }
 0x3eb   :  { %868 = vsyncadd [#allocation3], 4294967168 }
 0x3ec   :  { %765 = vsyncpa [#allocation3], 1 }

</bundles_post_ra>
